<compile_context>
chip_gen: v5e
topology: v5e:2x2
jax: 0.10.0
libtpu: 0.0.40
codegen_flags: <defaults>
</compile_context>

<pallas_src>
import jax
import jax.numpy as jnp
from jax.experimental import pallas as pl
from jax.experimental.pallas import tpu as pltpu

_LANE = 128
_SUBLANE = 8
_TILE_BYTES = 4 << 20                  # 4 MiB per buffer; 4 bufs (2 in + 2 out) = 16 MiB
_VMEM_LIMIT = 32 * 1024 * 1024         # explicit: > v5e's 16 MiB default, < v7x 64 MiB phys


# ----------------------------- Pallas kernel ------------------------------ #
def _noisy_act_kernel(params_ref, x_ref, o_ref):
    # params_ref (SMEM scalar-prefetch, shape (4,) f32): [inv_s, s, lo, hi]
    inv_s = params_ref[0]
    s = params_ref[1]
    lo = params_ref[2]
    hi = params_ref[3]

    x = x_ref[...].astype(jnp.float32)                 # math in f32 on all gens
    xc = jnp.minimum(jnp.maximum(x, lo), hi)           # clamp to [b-q/2, b+q/2]
    q_int = jnp.round(xc * inv_s)                      # exact: s is a power of two
    o_ref[...] = (q_int * s).astype(o_ref.dtype)       # dequantize, native dtype out


# ------------------------------ Helpers ----------------------------------- #
def _choose_tile_rows(rows, width, itemsize, tile_bytes):
    """Pick the row-block size: big tiles, but >=4 grid steps for mid-size inputs."""
    if rows < _SUBLANE:
        return rows                                    # block dim == full array dim (allowed)
    budget = max(_SUBLANE, (tile_bytes // (width * itemsize)) // _SUBLANE * _SUBLANE)
    tr = min(budget, rows)
    if rows >= 4 * _SUBLANE:
        # Guarantee a handful of grid steps so DMA/compute overlap (and the
        # grid can split across v7x's two TensorCores).
        quarter = max(_SUBLANE, (-(-rows // 4)) // _SUBLANE * _SUBLANE)
        tr = min(tr, quarter)
    return max(_SUBLANE, (tr // _SUBLANE) * _SUBLANE)


# ------------------------------ Wrapper ----------------------------------- #
def noisy_act_forward(x, log_act_s, log_act_q, act_b, *, signed=True,
                      tile_bytes=_TILE_BYTES):
    """NoisyAct forward (ROUND_VAL mode) for arbitrary-shape x, native dtype I/O."""
    orig_shape = x.shape
    orig_dtype = x.dtype

    s = jnp.exp2(log_act_s.astype(jnp.float32)).reshape(())
    inv_s = jnp.exp2(-log_act_s.astype(jnp.float32)).reshape(())
    q_half = jnp.exp2(log_act_q.astype(jnp.float32)).reshape(()) * 0.5
    b = act_b.astype(jnp.float32).reshape(()) if signed else q_half
    params = jnp.stack([inv_s, s, b - q_half, b + q_half]).astype(jnp.float32)

    flat = x.reshape(-1)                               # bitcast, free
    n = flat.shape[0]
    if n == 0:
        return x

    itemsize = jnp.dtype(orig_dtype).itemsize

    def _run_kernel(x2):
        rows, width = x2.shape
        tr = _choose_tile_rows(rows, width, itemsize, tile_bytes)
        grid = (pl.cdiv(rows, tr),)                    # partial trailing block is masked
        nbytes = rows * width * itemsize
        return pl.pallas_call(
            _noisy_act_kernel,
            out_shape=jax.ShapeDtypeStruct((rows, width), orig_dtype),
            grid_spec=pltpu.PrefetchScalarGridSpec(
                num_scalar_prefetch=1,                 # params -> SMEM, once
                grid=grid,
                in_specs=[pl.BlockSpec((tr, width), lambda i, p: (i, 0))],
                out_specs=pl.BlockSpec((tr, width), lambda i, p: (i, 0)),
            ),
            compiler_params=pltpu.CompilerParams(
                dimension_semantics=("parallel",),     # megacore sharding (v7x)
                vmem_limit_bytes=_VMEM_LIMIT,          # 16 MiB of buffers + headroom
            ),
            cost_estimate=pl.CostEstimate(
                flops=5 * rows * width,
                transcendentals=0,
                bytes_accessed=2 * nbytes,             # read x + write y
            ),
        )(params, x2)

    # Common case: element count divisible by 128 -> single kernel over the
    # whole array, fed by a free reshape (no slice / pad / concat HBM passes).
    # Use the widest lane-dense width that divides n.
    width = None
    for cand in (8 * _LANE, 4 * _LANE, 2 * _LANE, _LANE):
        if n % cand == 0:
            width = cand
            break
    if width is not None:
        return _run_kernel(flat.reshape(-1, width)).reshape(orig_shape)

    # Ragged case (rare): kernel covers the 128-aligned prefix, the <128
    # element tail is done with plain XLA ops.
    # TODO(synk): the prefix slice + concatenate still cost extra HBM passes
    # for ragged element counts; could be removed with a manual-DMA (pl.ANY)
    # path if such shapes ever matter.
    n_main = (n // _LANE) * _LANE
    pieces = []
    if n_main > 0:
        pieces.append(_run_kernel(flat[:n_main].reshape(-1, _LANE)).reshape(-1))
    xt = flat[n_main:].astype(jnp.float32)
    xt = jnp.minimum(jnp.maximum(xt, params[2]), params[3])
    pieces.append((jnp.round(xt * params[0]) * params[1]).astype(orig_dtype))
    out = jnp.concatenate(pieces) if len(pieces) > 1 else pieces[0]
    return out.reshape(orig_shape)


# ------------------------------ Reference --------------------------------- #
def noisy_act_reference(x, log_act_s, log_act_q, act_b, *, signed=True):
    s = jnp.exp2(log_act_s.astype(jnp.float32)).reshape(())
    q = jnp.exp2(log_act_q.astype(jnp.float32)).reshape(())
    q_half = q * 0.5
    b = act_b.astype(jnp.float32).reshape(()) if signed else q_half
    xc = jnp.clip(x.astype(jnp.float32), b - q_half, b + q_half)
    return jnp.round(xc / s) * s


# -------------------------------- Main ------------------------------------ #
if __name__ == "__main__":
    key = jax.random.PRNGKey(0)
    k1, k2, k3, k4 = jax.random.split(key, 4)

    # Module __init__(init_s=-10, init_q=10, signed=True)
    log_act_s = jnp.array([-10.0], dtype=jnp.float32)   # scale = 2^-10
    log_act_q = jnp.array([10.0], dtype=jnp.float32)    # range  = 2^10
    act_b = jnp.array([0.0], dtype=jnp.float32)         # signed=True -> bias, init 0

    # 1) aligned f32 NCHW activation (2*4*16*16 = 2048 elems -> (2, 1024) slab)
    x1 = jax.random.normal(k1, (2, 4, 16, 16), dtype=jnp.float32) * 3.0
    y1 = jax.block_until_ready(noisy_act_forward(x1, log_act_s, log_act_q, act_b))
    r1 = noisy_act_reference(x1, log_act_s, log_act_q, act_b)
    assert y1.shape == x1.shape and y1.dtype == x1.dtype
    assert jnp.allclose(y1, r1, atol=1e-6, rtol=0.0), "aligned f32 mismatch"

    # 2) ragged f32 shape (2*3*15*17 = 1530 elems -> 1408 in-kernel + 122 XLA tail,
    #    with a masked partial trailing row block inside the kernel)
    x2 = jax.random.normal(k2, (2, 3, 15, 17), dtype=jnp.float32) * 3.0
    y2 = jax.block_until_ready(noisy_act_forward(x2, log_act_s, log_act_q, act_b))
    r2 = noisy_act_reference(x2, log_act_s, log_act_q, act_b)
    assert y2.shape == x2.shape
    assert jnp.allclose(y2, r2, atol=1e-6, rtol=0.0), "ragged f32 mismatch"

    # 3) native bf16 I/O (half the HBM traffic; math still in f32 inside kernel)
    x3 = (jax.random.normal(k3, (2, 4, 16, 16), dtype=jnp.float32) * 3.0
          ).astype(jnp.bfloat16)
    y3 = jax.block_until_ready(noisy_act_forward(x3, log_act_s, log_act_q, act_b))
    r3 = noisy_act_reference(x3, log_act_s, log_act_q, act_b).astype(jnp.bfloat16)
    assert y3.dtype == jnp.bfloat16 and y3.shape == x3.shape
    assert jnp.allclose(y3.astype(jnp.float32), r3.astype(jnp.float32),
                        atol=2e-2, rtol=0.0), "bf16 mismatch"

    # 4) multi-step grid path (4*8*32*32 = 32768 elems -> 4 grid steps) + signed=False
    x4 = jax.random.normal(k4, (4, 8, 32, 32), dtype=jnp.float32) * 3.0
    y4 = jax.block_until_ready(
        noisy_act_forward(x4, log_act_s, log_act_q, act_b, signed=False))
    r4 = noisy_act_reference(x4, log_act_s, log_act_q, act_b, signed=False)
    assert y4.shape == x4.shape
    assert jnp.allclose(y4, r4, atol=1e-6, rtol=0.0), "multi-step / unsigned mismatch"

    print("KERNEL_OK")
</pallas_src>

<mosaic_0001>
module attributes {stable_mosaic.version = 11 : i64} {
  func.func @_noisy_act_kernel(%arg0: i32, %arg1: memref<4xf32, #tpu.memory_space<smem>>, %arg2: memref<2x1024xf32, #tpu.memory_space<vmem>>, %arg3: memref<2x1024xf32, #tpu.memory_space<vmem>>) attributes {dimension_semantics = [#tpu.dimension_semantics<parallel>], iteration_bounds = array<i64: 1>, scalar_prefetch = 1 : i64, scratch_operands = 0 : i64, tpu.core_type = #tpu.core_type<tc>, window_params = [{transform_indices = @transform_0, window_bounds = array<i64: 2, 1024>}, {transform_indices = @transform_1, window_bounds = array<i64: 2, 1024>}]} {
    %c0 = arith.constant 0 : index
    %0 = memref.load %arg1[%c0] : memref<4xf32, #tpu.memory_space<smem>>
    %c1 = arith.constant 1 : index
    %1 = memref.load %arg1[%c1] : memref<4xf32, #tpu.memory_space<smem>>
    %c2 = arith.constant 2 : index
    %2 = memref.load %arg1[%c2] : memref<4xf32, #tpu.memory_space<smem>>
    %c3 = arith.constant 3 : index
    %3 = memref.load %arg1[%c3] : memref<4xf32, #tpu.memory_space<smem>>
    %c0_0 = arith.constant 0 : index
    %c0_1 = arith.constant 0 : index
    %4 = vector.load %arg2[%c0_0, %c0_1] : memref<2x1024xf32, #tpu.memory_space<vmem>>, vector<2x1024xf32>
    %5 = vector.broadcast %2 : f32 to vector<2x1024xf32>
    %6 = arith.maximumf %4, %5 : vector<2x1024xf32>
    %7 = vector.broadcast %3 : f32 to vector<2x1024xf32>
    %8 = arith.minimumf %6, %7 : vector<2x1024xf32>
    %9 = vector.broadcast %0 : f32 to vector<2x1024xf32>
    %10 = arith.mulf %8, %9 : vector<2x1024xf32>
    %11 = math.roundeven %10 : vector<2x1024xf32>
    %12 = vector.broadcast %1 : f32 to vector<2x1024xf32>
    %13 = arith.mulf %11, %12 : vector<2x1024xf32>
    %c0_2 = arith.constant 0 : index
    %c0_3 = arith.constant 0 : index
    %14 = vector.load %arg3[%c0_2, %c0_3] : memref<2x1024xf32, #tpu.memory_space<vmem>>, vector<2x1024xf32>
    tpu.vector_store %arg3[%c0_2, %c0_3], %13 {strides = array<i32>} : memref<2x1024xf32, #tpu.memory_space<vmem>>, vector<2x1024xf32>,
    return
  }
  func.func @transform_0(%arg0: i32, %arg1: memref<4xf32, #tpu.memory_space<smem>>) -> (i32, i32) {
    %c0_i32 = arith.constant 0 : i32
    %c0_i32_0 = arith.constant 0 : i32
    return %arg0, %c0_i32 : i32, i32
  }
  func.func @transform_1(%arg0: i32, %arg1: memref<4xf32, #tpu.memory_space<smem>>) -> (i32, i32) {
    %c0_i32 = arith.constant 0 : i32
    %c0_i32_0 = arith.constant 0 : i32
    return %arg0, %c0_i32 : i32, i32
  }
}

</mosaic_0001>

<bundles_post_ra>
// kernel: tpu_custom_call.1
= control target key start
LH: loop header
LB: loop body
LE: loop exit
PB: predicated region body
PF: predicated region fallthrough
CT: control target
= control target key end

     0   :  { %s159_s12 = smov [#allocation3]   ;;  %s186_s0 = inlined_call_operand.hbm [shape: f32[4], index: 0, kind: input, shape index: {}]   ;;  %s187_s1 = inlined_call_operand.hbm [shape: f32[2,1024], index: 1, kind: input, shape index: {}]   ;;  %s188_s2 = inlined_call_operand.hbm [shape: f32[2,1024], index: 2, kind: output, shape index: {}]  }
   0x1   :  { %s8_s11 = sshll.u32 %s186_s0, 4  ;;  %s9_s11 = int_to_ptr.hbm [resolvable:$true] %s8_s11 }
   0x2   :  { %11 = dma.hbm_to_smem %s9_s11, 16, %s159_s12, [#allocation2] }
   0x3   :  { %153 = dma.done.wait [#allocation2], 16 }
   0x4   :  { %154 = vsyncadd [#allocation2], 4294967280 }
   0x5   :  { %14 = sfence }
   0x6   :  { %15 = vsyncpa [#allocation5], 0 }
   0x7   :  { %16 = vsyncpa [#allocation6], 0  ;;  %s22_s15 = sshll.u32 %s187_s1, 4  ;;  %s160_s16 = smov [#allocation4]   ;;  %s23_s15 = int_to_ptr.hbm [resolvable:$true] %s22_s15 }
   0x8   :  { %s24_s17 = sshll.u32 %s160_s16, 4  ;;  %s25_s17 = int_to_ptr.vmem [resolvable:$true] %s24_s17 }
   0x9   :  { %27 = dma.hbm_to_vmem [thread:$0]  %s23_s15, 256, %s25_s17, [#allocation5]  }
   0xa   :  { %155 = dma.done.wait [#allocation5], 256  }
   0xb   :  { %156 = vsyncadd [#allocation5], 4294967040  ;;  %s32_s0 = sld [smem:[#allocation3]]  ;;  %v36_v0 = vld [vmem:[#allocation4] sm:$0xff]  ;;  %v37_v1 = vld [vmem:[#allocation4 + $0x8] sm:$0xff]  ;;  %s161_s20 = smov [#allocation7]  }
   0xc   :  { %s72_s18 = sld [smem:[#allocation3 + $0x2]]  ;;  %s59_s21 = sshll.u32 %s161_s20, 4  ;;  %s60_s21 = int_to_ptr.vmem [resolvable:$true] %s59_s21 }
   0xd   :  { %s73_s19 = sld [smem:[#allocation3 + $0x3]]  ;;  %s61_s24 = sshll.u32 %s188_s2, 4  ;;  %s62_s24 = int_to_ptr.hbm [resolvable:$true] %s61_s24 }
   0xe   :  { %s71_s1 = sld [smem:[#allocation3 + $0x1]] }
  0x11   :  { %v44_v6 = vstv %s32_s0 }
  0x12   :  { %v38_v2 = vstv %s72_s18 }
  0x13   :  { %v39_v3 = vmax.f32 %v36_v0, %v38_v2  ;;  %v41_v4 = vstv %s73_s19  ;;  %v40_v5 = vmax.f32 %v37_v1, %v38_v2 }
  0x14   :  { %v49_v22 = vstv %s71_s1 }
  0x15   :  { %v42_v7 = vmin.f32 %v39_v3, %v41_v4  ;;  %v43_v8 = vmin.f32 %v40_v5, %v41_v4 }
  0x17   :  { %v45_v9 = vmul.f32 %v44_v6, %v42_v7  ;;  %v46_v10 = vmul.f32 %v44_v6, %v43_v8 }
  0x19   :  { %v76_v11 = vcvt.f32.s32 %v45_v9  ;;  %v74_v12 = vand.u32 2147483647, %v45_v9  ;;  %v84_v13 = vcvt.f32.s32 %v46_v10  ;;  %v79_v15 = vand.u32 2147483648, %v45_v9 }
  0x1a   :  { %v82_v16 = vand.u32 2147483647, %v46_v10  ;;  %v87_v18 = vand.u32 2147483648, %v46_v10 }
  0x1b   :  { %v77_v14 = vcvt.s32.f32 %v76_v11  ;;  %v85_v17 = vcvt.s32.f32 %v84_v13  ;;  %vm75_vm0 = vcmp.lt.f32.partialorder %v74_v12, 8388608.0 }
  0x1c   :  { %vm83_vm1 = vcmp.lt.f32.partialorder %v82_v16, 8388608.0 }
  0x1d   :  { %v78_v19 = vand.u32 2147483647, %v77_v14  ;;  %v86_v20 = vand.u32 2147483647, %v85_v17 }
  0x1f   :  { %v80_v21 = vor.u32 %v79_v15, %v78_v19  ;;  %v88_v23 = vor.u32 %v87_v18, %v86_v20 }
  0x21   :  { %v81_v24 = vsel %vm75_vm0, %v80_v21, %v45_v9  ;;  %v89_v26 = vsel %vm83_vm1, %v88_v23, %v46_v10 }
  0x22   :  { %v50_v25 = vmul.f32 %v81_v24, %v49_v22  ;;  %v51_v27 = vmul.f32 %v89_v26, %v49_v22 }
  0x24   :  { %52 = vst [vmem:[#allocation7] sm:$0xff] %v50_v25 }
  0x25   :  { %53 = vst [vmem:[#allocation7 + $0x8] sm:$0xff] %v51_v27 }
  0x26   :  { %64 = dma.vmem_to_hbm [thread:$0]  %s60_s21, 256, %s62_s24, [#allocation6]  }
  0x27   :  { %157 = dma.done.wait [#allocation6], 256  }
  0x28   :  { %158 = vsyncadd [#allocation6], 4294967040 }
  0x29   :  { %69 = vsyncpa [#allocation5], 1 }
  0x2a   :  { %70 = vsyncpa [#allocation6], 1 }

</bundles_post_ra>
